<compile_context>
chip_gen: v6e
topology: v6e:2x2x1
jax: 0.10.0
libtpu: 0.0.40
codegen_flags: <defaults>
</compile_context>

<pallas_src>
import functools

import jax
import jax.numpy as jnp
from jax import lax
from jax.experimental import pallas as pl
from jax.experimental.pallas import tpu as pltpu

BN_EPS = 1e-5
NEG_SLOPE = 0.1
LANE = 128
SUBLANE = 8
MAX_TILE_L = 512
VMEM_LIMIT = 40 * 1024 * 1024  # < v7x 64 MiB physical, > default scoped limits


def _round_up(x, m):
    return (x + m - 1) // m * m


def _conv_tile(x_ref, w_ref, k_size, tile_l):
    """Conv for one (batch, L-tile): W(Cpad,K*Cin) @ patches(K*Cin,tile_l)."""
    xt = x_ref[0, 0]                                   # (Cin, tile_l + K - 1) bf16
    xcat = jnp.concatenate(
        [xt[:, k:k + tile_l] for k in range(k_size)], axis=0)  # (K*Cin, tile_l)
    return jnp.dot(w_ref[...], xcat,
                   preferred_element_type=jnp.float32)  # (Cpad, tile_l) f32


def _stats_kernel(x_ref, w_ref, stats_ref, *, k_size, tile_l, l_out):
    """Pass 1: conv + per-batch partial channel sum / sum-of-squares."""
    lt = pl.program_id(1)

    y = _conv_tile(x_ref, w_ref, k_size, tile_l)        # (Cpad, tile_l)
    cpad = y.shape[0]

    # Mask output positions beyond the true output length (tile padding).
    col = lt * tile_l + lax.broadcasted_iota(jnp.int32, (1, tile_l), 1)
    y = jnp.where(col < l_out, y, 0.0)

    @pl.when(lt == 0)
    def _():
        stats_ref[...] = jnp.zeros_like(stats_ref)

    s1 = jnp.sum(y, axis=1, keepdims=True)              # (Cpad, 1)
    s2 = jnp.sum(y * y, axis=1, keepdims=True)          # (Cpad, 1)
    upd = jnp.concatenate([s1, s2, jnp.zeros((cpad, 6), jnp.float32)], axis=1)
    stats_ref[0] += upd                                  # (Cpad, 8) accumulator


def _apply_kernel(x_ref, w_ref, ss_ref, o_ref, *, k_size, tile_l, cout):
    """Pass 2: conv (recomputed) + folded BN scale/shift + LeakyReLU -> NCL."""
    y = _conv_tile(x_ref, w_ref, k_size, tile_l)         # (Cpad, tile_l) f32
    ss = ss_ref[...]                                     # (Cpad, 8) f32
    y = y * ss[:, 0:1] + ss[:, 1:2]                      # scale / shift
    y = jnp.where(y >= 0, y, NEG_SLOPE * y)              # LeakyReLU(0.1)
    o_ref[0] = y[:cout, :].astype(o_ref.dtype)           # lane-dense NCL tile


@functools.partial(jax.jit, static_argnames=("kernel_size", "padding"))
def up_sampling_layer(x, w, b, gamma, beta, *, kernel_size=5, padding=2):
    """Conv1d(stride=1) + BatchNorm1d(training) + LeakyReLU(0.1).

    x: (N, Cin, L) f32 -> (N, Cout, L_out) f32, L_out = L + 2*padding - K + 1.
    The conv bias `b` is mathematically cancelled by the BN mean subtraction.
    """
    del b  # cancelled exactly by training-mode batch normalization
    n, cin, length = x.shape
    cout, _, k_size = w.shape
    assert k_size == kernel_size
    l_out = length + 2 * padding - (kernel_size - 1)

    if l_out <= MAX_TILE_L:
        tile_l = _round_up(l_out, SUBLANE)
        num_lt = 1
    else:
        tile_l = MAX_TILE_L
        num_lt = pl.cdiv(l_out, tile_l)
    l_rows = tile_l * num_lt
    cpad = _round_up(cout, LANE)
    halo = kernel_size - 1
    kc = kernel_size * cin

    # ---- host-side prep: halo-tiled bf16 x (NCL layout kept), packed weights.
    x_pad = jnp.pad(x, ((0, 0), (0, 0), (padding, padding + l_rows - l_out)))
    idx = (jnp.arange(num_lt) * tile_l)[:, None] + jnp.arange(tile_l + halo)[None, :]
    # (N, num_lt, Cin, tile_l + K - 1); halo duplication is only (K-1)/tile_l.
    x_tiles = jnp.transpose(x_pad[:, :, idx], (0, 2, 1, 3)).astype(jnp.bfloat16)

    # W as (Cpad, K*Cin): [co, k*Cin + ci] = w[co, ci, k]  (matches xcat order).
    w_mat = jnp.transpose(w, (0, 2, 1)).reshape(cout, kc)
    w_mat = jnp.pad(w_mat, ((0, cpad - cout), (0, 0))).astype(jnp.bfloat16)

    grid = (n, num_lt)
    x_spec = pl.BlockSpec((1, 1, cin, tile_l + halo), lambda i, j: (i, j, 0, 0))
    w_spec = pl.BlockSpec((cpad, kc), lambda i, j: (0, 0))

    # ---- pass 1: per-batch partial sum / sum-of-squares ---------------------
    stats = pl.pallas_call(
        functools.partial(_stats_kernel, k_size=kernel_size, tile_l=tile_l,
                          l_out=l_out),
        grid=grid,
        in_specs=[x_spec, w_spec],
        out_specs=pl.BlockSpec((1, cpad, 8), lambda i, j: (i, 0, 0)),
        out_shape=jax.ShapeDtypeStruct((n, cpad, 8), jnp.float32),
        compiler_params=pltpu.CompilerParams(
            dimension_semantics=("parallel", "arbitrary"),
            vmem_limit_bytes=VMEM_LIMIT),
    )(x_tiles, w_mat)

    # ---- fold BN into per-channel scale / shift (tiny, plain JAX) -----------
    count = n * l_out
    s1 = jnp.sum(stats[:, :, 0], axis=0)
    s2 = jnp.sum(stats[:, :, 1], axis=0)
    mean = s1 / count
    var = jnp.maximum(s2 / count - mean * mean, 0.0)     # biased var (BN train)
    gamma_p = jnp.pad(gamma.astype(jnp.float32), (0, cpad - cout))
    beta_p = jnp.pad(beta.astype(jnp.float32), (0, cpad - cout))
    scale = gamma_p * lax.rsqrt(var + BN_EPS)
    shift = beta_p - mean * scale
    ss = jnp.zeros((cpad, 8), jnp.float32).at[:, 0].set(scale).at[:, 1].set(shift)

    # ---- pass 2: conv + normalize + LeakyReLU, direct NCL output ------------
    out = pl.pallas_call(
        functools.partial(_apply_kernel, k_size=kernel_size, tile_l=tile_l,
                          cout=cout),
        grid=grid,
        in_specs=[x_spec, w_spec, pl.BlockSpec((cpad, 8), lambda i, j: (0, 0))],
        out_specs=pl.BlockSpec((1, cout, tile_l), lambda i, j: (i, 0, j)),
        out_shape=jax.ShapeDtypeStruct((n, cout, l_rows), jnp.float32),
        compiler_params=pltpu.CompilerParams(
            dimension_semantics=("parallel", "parallel"),
            vmem_limit_bytes=VMEM_LIMIT),
    )(x_tiles, w_mat, ss)

    return out[:, :, :l_out]


def _reference(x, w, b, gamma, beta, padding=2):
    """Plain-JAX reference (conv + training-mode BN + LeakyReLU).

    x/w are pre-quantized to bf16 (and back) to match the kernel's MXU input
    precision; all accumulation / BN math stays in f32.
    """
    xq = x.astype(jnp.bfloat16).astype(jnp.float32)
    wq = w.astype(jnp.bfloat16).astype(jnp.float32)
    y = lax.conv_general_dilated(
        xq, wq, window_strides=(1,), padding=[(padding, padding)],
        dimension_numbers=("NCH", "OIH", "NCH"),
        precision=lax.Precision.HIGHEST)
    y = y + b[None, :, None]
    mean = jnp.mean(y, axis=(0, 2), keepdims=True)
    var = jnp.mean((y - mean) ** 2, axis=(0, 2), keepdims=True)
    y = (y - mean) * lax.rsqrt(var + BN_EPS)
    y = y * gamma[None, :, None] + beta[None, :, None]
    return jnp.where(y >= 0, y, NEG_SLOPE * y)


if __name__ == "__main__":
    N, C_IN, C_OUT, L, K, PAD = 2, 4, 8, 16, 5, 2

    key = jax.random.PRNGKey(0)
    kx, kw, kb, kg, kbe = jax.random.split(key, 5)

    x = jax.random.normal(kx, (N, C_IN, L), dtype=jnp.float32)
    # Deterministic synthetic parameters (PyTorch shapes).
    w = jax.random.normal(kw, (C_OUT, C_IN, K), dtype=jnp.float32) * 0.1
    b = jax.random.normal(kb, (C_OUT,), dtype=jnp.float32) * 0.1
    gamma = 1.0 + 0.1 * jax.random.normal(kg, (C_OUT,), dtype=jnp.float32)
    beta = 0.1 * jax.random.normal(kbe, (C_OUT,), dtype=jnp.float32)

    out = up_sampling_layer(x, w, b, gamma, beta, kernel_size=K, padding=PAD)
    out = jax.block_until_ready(out)

    ref = _reference(x, w, b, gamma, beta, padding=PAD)
    assert out.shape == (N, C_OUT, L)
    max_err = float(jnp.max(jnp.abs(out - ref)))
    assert jnp.allclose(out, ref, atol=1e-3, rtol=1e-3), f"max err {max_err}"

    print("KERNEL_OK")
</pallas_src>

<mosaic_0001>
module attributes {stable_mosaic.version = 11 : i64} {
  func.func @_stats_kernel(%arg0: i32, %arg1: i32, %arg2: memref<1x1x4x20xbf16, #tpu.memory_space<vmem>>, %arg3: memref<128x20xbf16, #tpu.memory_space<vmem>>, %arg4: memref<1x128x8xf32, #tpu.memory_space<vmem>>) attributes {dimension_semantics = [#tpu.dimension_semantics<parallel>, #tpu.dimension_semantics<arbitrary>], iteration_bounds = array<i64: 2, 1>, scalar_prefetch = 0 : i64, scratch_operands = 0 : i64, tpu.core_type = #tpu.core_type<tc>, window_params = [{transform_indices = @transform_0, window_bounds = array<i64: 1, 1, 4, 20>}, {pipeline_mode = #tpu.pipeline_mode<synchronous>, transform_indices = @transform_1, window_bounds = array<i64: 128, 20>}, {transform_indices = @transform_2, window_bounds = array<i64: 1, 128, 8>}]} {
    %c0 = arith.constant 0 : index
    %c0_0 = arith.constant 0 : index
    %c0_1 = arith.constant 0 : index
    %c0_2 = arith.constant 0 : index
    %0 = vector.load %arg2[%c0, %c0_0, %c0_1, %c0_2] : memref<1x1x4x20xbf16, #tpu.memory_space<vmem>>, vector<1x1x4x20xbf16>
    %1 = vector.shape_cast %0 : vector<1x1x4x20xbf16> to vector<4x20xbf16>
    %2 = vector.extract_strided_slice %1 {offsets = [0, 0], sizes = [4, 16], strides = [1, 1]} : vector<4x20xbf16> to vector<4x16xbf16>
    %3 = vector.extract_strided_slice %1 {offsets = [0, 1], sizes = [4, 16], strides = [1, 1]} : vector<4x20xbf16> to vector<4x16xbf16>
    %4 = vector.extract_strided_slice %1 {offsets = [0, 2], sizes = [4, 16], strides = [1, 1]} : vector<4x20xbf16> to vector<4x16xbf16>
    %5 = vector.extract_strided_slice %1 {offsets = [0, 3], sizes = [4, 16], strides = [1, 1]} : vector<4x20xbf16> to vector<4x16xbf16>
    %6 = vector.extract_strided_slice %1 {offsets = [0, 4], sizes = [4, 16], strides = [1, 1]} : vector<4x20xbf16> to vector<4x16xbf16>
    %7 = tpu.concatenate %2, %3, %4, %5, %6 in 0 : vector<4x16xbf16>, vector<4x16xbf16>, vector<4x16xbf16>, vector<4x16xbf16>, vector<4x16xbf16> -> vector<20x16xbf16>
    %c0_3 = arith.constant 0 : index
    %c0_4 = arith.constant 0 : index
    %8 = vector.load %arg3[%c0_3, %c0_4] : memref<128x20xbf16, #tpu.memory_space<vmem>>, vector<128x20xbf16>
    %cst = arith.constant dense<0.000000e+00> : vector<128x16xf32>
    %9 = tpu.matmul %8, %7, %cst {dimension_numbers = #tpu.dot_dimension_numbers<[1], [0], [0], [1], [0, 0, 1, 1], [], []>} : vector<128x20xbf16>, vector<20x16xbf16>, vector<128x16xf32> -> vector<128x16xf32>
    %c16_i32 = arith.constant 16 : i32
    %10 = arith.muli %arg1, %c16_i32 : i32
    %11 = tpu.iota {dimensions = array<i32: 1>} : vector<1x16xi32>
    %12 = vector.broadcast %10 : i32 to vector<1x16xi32>
    %13 = arith.addi %12, %11 : vector<1x16xi32>
    %c16_i32_5 = arith.constant 16 : i32
    %14 = vector.broadcast %c16_i32_5 : i32 to vector<1x16xi32>
    %15 = arith.cmpi slt, %13, %14 : vector<1x16xi32>
    %cst_6 = arith.constant 0.000000e+00 : f32
    %16 = vector.shape_cast %15 : vector<1x16xi1> to vector<1x16xi1>
    %17 = vector.broadcast %16 : vector<1x16xi1> to vector<128x16xi1>
    %18 = vector.broadcast %cst_6 : f32 to vector<128x16xf32>
    %19 = arith.select %17, %9, %18 : vector<128x16xi1>, vector<128x16xf32>
    %c0_i32 = arith.constant 0 : i32
    %20 = arith.cmpi eq, %arg1, %c0_i32 : i32
    %21 = arith.extui %20 : i1 to i32
    %c0_i32_7 = arith.constant 0 : i32
    %22 = arith.cmpi ne, %21, %c0_i32_7 : i32
    scf.if %22 {
      %cst_17 = arith.constant 0.000000e+00 : f32
      %36 = vector.broadcast %cst_17 : f32 to vector<1x128x8xf32>
      %c0_18 = arith.constant 0 : index
      %c0_19 = arith.constant 0 : index
      %c0_20 = arith.constant 0 : index
      %37 = vector.load %arg4[%c0_18, %c0_19, %c0_20] : memref<1x128x8xf32, #tpu.memory_space<vmem>>, vector<1x128x8xf32>
      tpu.vector_store %arg4[%c0_18, %c0_19, %c0_20], %36 {strides = array<i32>} : memref<1x128x8xf32, #tpu.memory_space<vmem>>, vector<1x128x8xf32>,
    } else {
    }
    %cst_8 = arith.constant dense<0.000000e+00> : vector<128xf32>
    %23 = vector.multi_reduction <add>, %19, %cst_8 [1] : vector<128x16xf32> to vector<128xf32>
    %24 = vector.shape_cast %23 : vector<128xf32> to vector<128x1xf32>
    %25 = arith.mulf %19, %19 : vector<128x16xf32>
    %cst_9 = arith.constant dense<0.000000e+00> : vector<128xf32>
    %26 = vector.multi_reduction <add>, %25, %cst_9 [1] : vector<128x16xf32> to vector<128xf32>
    %27 = vector.shape_cast %26 : vector<128xf32> to vector<128x1xf32>
    %cst_10 = arith.constant 0.000000e+00 : f32
    %28 = vector.broadcast %cst_10 : f32 to vector<128x6xf32>
    %29 = tpu.concatenate %24, %27, %28 in 1 : vector<128x1xf32>, vector<128x1xf32>, vector<128x6xf32> -> vector<128x8xf32>
    %c0_11 = arith.constant 0 : index
    %c0_12 = arith.constant 0 : index
    %c0_13 = arith.constant 0 : index
    %30 = vector.load %arg4[%c0_11, %c0_12, %c0_13] : memref<1x128x8xf32, #tpu.memory_space<vmem>>, vector<1x128x8xf32>
    %31 = vector.shape_cast %30 : vector<1x128x8xf32> to vector<128x8xf32>
    %32 = arith.addf %31, %29 : vector<128x8xf32>
    %c0_14 = arith.constant 0 : index
    %c0_15 = arith.constant 0 : index
    %c0_16 = arith.constant 0 : index
    %33 = vector.load %arg4[%c0_14, %c0_15, %c0_16] : memref<1x128x8xf32, #tpu.memory_space<vmem>>, vector<1x128x8xf32>
    %34 = vector.shape_cast %33 : vector<1x128x8xf32> to vector<128x8xf32>
    %35 = vector.shape_cast %32 : vector<128x8xf32> to vector<1x128x8xf32>
    tpu.vector_store %arg4[%c0_14, %c0_15, %c0_16], %35 {strides = array<i32>} : memref<1x128x8xf32, #tpu.memory_space<vmem>>, vector<1x128x8xf32>,
    return
  }
  func.func @transform_0(%arg0: i32, %arg1: i32) -> (i32, i32, i32, i32) {
    %c0_i32 = arith.constant 0 : i32
    %c0_i32_0 = arith.constant 0 : i32
    %c0_i32_1 = arith.constant 0 : i32
    return %arg0, %arg1, %c0_i32, %c0_i32_0 : i32, i32, i32, i32
  }
  func.func @transform_1(%arg0: i32, %arg1: i32) -> (i32, i32) {
    %c0_i32 = arith.constant 0 : i32
    %c0_i32_0 = arith.constant 0 : i32
    %c0_i32_1 = arith.constant 0 : i32
    return %c0_i32, %c0_i32_0 : i32, i32
  }
  func.func @transform_2(%arg0: i32, %arg1: i32) -> (i32, i32, i32) {
    %c0_i32 = arith.constant 0 : i32
    %c0_i32_0 = arith.constant 0 : i32
    %c0_i32_1 = arith.constant 0 : i32
    return %arg0, %c0_i32, %c0_i32_0 : i32, i32, i32
  }
}

module attributes {stable_mosaic.version = 11 : i64} {
  func.func @_apply_kernel(%arg0: i32, %arg1: i32, %arg2: memref<1x1x4x20xbf16, #tpu.memory_space<vmem>>, %arg3: memref<128x20xbf16, #tpu.memory_space<vmem>>, %arg4: memref<128x8xf32, #tpu.memory_space<vmem>>, %arg5: memref<1x8x16xf32, #tpu.memory_space<vmem>>) attributes {dimension_semantics = [#tpu.dimension_semantics<parallel>, #tpu.dimension_semantics<parallel>], iteration_bounds = array<i64: 2, 1>, scalar_prefetch = 0 : i64, scratch_operands = 0 : i64, tpu.core_type = #tpu.core_type<tc>, window_params = [{transform_indices = @transform_0, window_bounds = array<i64: 1, 1, 4, 20>}, {pipeline_mode = #tpu.pipeline_mode<synchronous>, transform_indices = @transform_1, window_bounds = array<i64: 128, 20>}, {pipeline_mode = #tpu.pipeline_mode<synchronous>, transform_indices = @transform_2, window_bounds = array<i64: 128, 8>}, {transform_indices = @transform_3, window_bounds = array<i64: 1, 8, 16>}]} {
    %c0 = arith.constant 0 : index
    %c0_0 = arith.constant 0 : index
    %c0_1 = arith.constant 0 : index
    %c0_2 = arith.constant 0 : index
    %0 = vector.load %arg2[%c0, %c0_0, %c0_1, %c0_2] : memref<1x1x4x20xbf16, #tpu.memory_space<vmem>>, vector<1x1x4x20xbf16>
    %1 = vector.shape_cast %0 : vector<1x1x4x20xbf16> to vector<4x20xbf16>
    %2 = vector.extract_strided_slice %1 {offsets = [0, 0], sizes = [4, 16], strides = [1, 1]} : vector<4x20xbf16> to vector<4x16xbf16>
    %3 = vector.extract_strided_slice %1 {offsets = [0, 1], sizes = [4, 16], strides = [1, 1]} : vector<4x20xbf16> to vector<4x16xbf16>
    %4 = vector.extract_strided_slice %1 {offsets = [0, 2], sizes = [4, 16], strides = [1, 1]} : vector<4x20xbf16> to vector<4x16xbf16>
    %5 = vector.extract_strided_slice %1 {offsets = [0, 3], sizes = [4, 16], strides = [1, 1]} : vector<4x20xbf16> to vector<4x16xbf16>
    %6 = vector.extract_strided_slice %1 {offsets = [0, 4], sizes = [4, 16], strides = [1, 1]} : vector<4x20xbf16> to vector<4x16xbf16>
    %7 = tpu.concatenate %2, %3, %4, %5, %6 in 0 : vector<4x16xbf16>, vector<4x16xbf16>, vector<4x16xbf16>, vector<4x16xbf16>, vector<4x16xbf16> -> vector<20x16xbf16>
    %c0_3 = arith.constant 0 : index
    %c0_4 = arith.constant 0 : index
    %8 = vector.load %arg3[%c0_3, %c0_4] : memref<128x20xbf16, #tpu.memory_space<vmem>>, vector<128x20xbf16>
    %cst = arith.constant dense<0.000000e+00> : vector<128x16xf32>
    %9 = tpu.matmul %8, %7, %cst {dimension_numbers = #tpu.dot_dimension_numbers<[1], [0], [0], [1], [0, 0, 1, 1], [], []>} : vector<128x20xbf16>, vector<20x16xbf16>, vector<128x16xf32> -> vector<128x16xf32>
    %c0_5 = arith.constant 0 : index
    %c0_6 = arith.constant 0 : index
    %10 = vector.load %arg4[%c0_5, %c0_6] : memref<128x8xf32, #tpu.memory_space<vmem>>, vector<128x8xf32>
    %11 = vector.extract_strided_slice %10 {offsets = [0, 0], sizes = [128, 1], strides = [1, 1]} : vector<128x8xf32> to vector<128x1xf32>
    %12 = vector.broadcast %11 : vector<128x1xf32> to vector<128x16xf32>
    %13 = arith.mulf %9, %12 : vector<128x16xf32>
    %14 = vector.extract_strided_slice %10 {offsets = [0, 1], sizes = [128, 1], strides = [1, 1]} : vector<128x8xf32> to vector<128x1xf32>
    %15 = vector.broadcast %14 : vector<128x1xf32> to vector<128x16xf32>
    %16 = arith.addf %13, %15 : vector<128x16xf32>
    %cst_7 = arith.constant 0.000000e+00 : f32
    %17 = vector.broadcast %cst_7 : f32 to vector<128x16xf32>
    %18 = arith.cmpf oge, %16, %17 : vector<128x16xf32>
    %cst_8 = arith.constant 1.000000e-01 : f32
    %19 = vector.broadcast %cst_8 : f32 to vector<128x16xf32>
    %20 = arith.mulf %19, %16 : vector<128x16xf32>
    %21 = arith.select %18, %16, %20 : vector<128x16xi1>, vector<128x16xf32>
    %22 = vector.extract_strided_slice %21 {offsets = [0, 0], sizes = [8, 16], strides = [1, 1]} : vector<128x16xf32> to vector<8x16xf32>
    %c0_9 = arith.constant 0 : index
    %c0_10 = arith.constant 0 : index
    %c0_11 = arith.constant 0 : index
    %23 = vector.load %arg5[%c0_9, %c0_10, %c0_11] : memref<1x8x16xf32, #tpu.memory_space<vmem>>, vector<1x8x16xf32>
    %24 = vector.shape_cast %23 : vector<1x8x16xf32> to vector<8x16xf32>
    %25 = vector.shape_cast %22 : vector<8x16xf32> to vector<1x8x16xf32>
    tpu.vector_store %arg5[%c0_9, %c0_10, %c0_11], %25 {strides = array<i32>} : memref<1x8x16xf32, #tpu.memory_space<vmem>>, vector<1x8x16xf32>,
    return
  }
  func.func @transform_0(%arg0: i32, %arg1: i32) -> (i32, i32, i32, i32) {
    %c0_i32 = arith.constant 0 : i32
    %c0_i32_0 = arith.constant 0 : i32
    %c0_i32_1 = arith.constant 0 : i32
    return %arg0, %arg1, %c0_i32, %c0_i32_0 : i32, i32, i32, i32
  }
  func.func @transform_1(%arg0: i32, %arg1: i32) -> (i32, i32) {
    %c0_i32 = arith.constant 0 : i32
    %c0_i32_0 = arith.constant 0 : i32
    %c0_i32_1 = arith.constant 0 : i32
    return %c0_i32, %c0_i32_0 : i32, i32
  }
  func.func @transform_2(%arg0: i32, %arg1: i32) -> (i32, i32) {
    %c0_i32 = arith.constant 0 : i32
    %c0_i32_0 = arith.constant 0 : i32
    %c0_i32_1 = arith.constant 0 : i32
    return %c0_i32, %c0_i32_0 : i32, i32
  }
  func.func @transform_3(%arg0: i32, %arg1: i32) -> (i32, i32, i32) {
    %c0_i32 = arith.constant 0 : i32
    %c0_i32_0 = arith.constant 0 : i32
    return %arg0, %c0_i32, %arg1 : i32, i32, i32
  }
}

</mosaic_0001>

<bundles_post_ra>
// kernel: up_sampling_layer.3
= control target key start
LH: loop header
LB: loop body
LE: loop exit
PB: predicated region body
PF: predicated region fallthrough
CT: control target
= control target key end

     0   :  { %8 = vsyncpa [#allocation3], 0  ;;  %s888_s0 = inlined_call_operand.vmem [shape: bf16[2,1,4,20], index: 0, kind: input, shape index: {}]   ;;  %s889_s1 = inlined_call_operand.vmem [shape: bf16[128,20], index: 1, kind: input, shape index: {}]   ;;  %s890_s2 = inlined_call_operand.vmem [shape: f32[128,8], index: 2, kind: input, shape index: {}]   ;;  %s891_s3 = inlined_call_operand.hbm [shape: f32[2,8,16], index: 3, kind: output, shape index: {}]  }
   0x1   :  { %10 = vsyncpa [#allocation3 + $0x1], 0  ;;  %s742_s12 = smov 0   ;;  %s744_s13 = smov 0  }
   0x2   :  { %s746_s14 = smov 0   ;;  %s748_s15 = smov 0  }
   0x3   :  { %s750_s16 = smov 0   ;;  %s752_s17 = smov 0  }
   0x4 LB: > { %s499_s18 = sadd.s32 4294967295, %s712_s17   ;;  %s500_s19 = sadd.s32 4294967294, %s712_s17   ;;  %s712_s17 = sphi %s752_s17, %s16_s17   ;;  %s708_s16 = sphi %s750_s16, %s898_s16   ;;  %s704_s15 = sphi %s748_s15, %s897_s15   ;;  %s700_s14 = sphi %s746_s14, %s896_s14   ;;  %s696_s13 = sphi %s744_s13, %s895_s13   ;;  %s692_s12 = sphi %s742_s12, %s894_s12  }
   0x5   : > { %s28_s20 = sadd.s32 1, %s708_s16  ;;  %s107_s21 = sadd.s32 1, %s700_s14 }
   0x6   : > { %p30_p0 = scmp.ge.s32.totalorder %s28_s20, 2  ;;  %p117_p1 = scmp.ne.s32.totalorder %s700_s14, %s696_s13 }
   0x7   : > { %p118_p2 = scmp.eq.s32.totalorder %s499_s18, 1  ;;  %p123_p3 = scmp.ne.s32.totalorder %s696_s13, %s692_s12 }
   0x8   : > { %s900_s20 = smov (%p30_p0, %s28_s20), 0  ;;  %p124_p5 = scmp.eq.s32.totalorder %s500_s19, 1 }
   0x9   : > { %p782_p4 = por %p118_p2, %p117_p1  ;;  %s102_s23 = ssub.s32 %s708_s16, %s900_s20 }
   0xa   : > { %p503_p6 = scmp.ge.s32.totalorder %s712_s17, 1  ;;  %p105_p7 = scmp.eq.s32.totalorder %s102_s23, 0 }
   0xb   : > { %p789_p8 = por %p124_p5, %p123_p3  ;;  %p158_p9 = scmp.lt.s32.totalorder %s712_s17, 3 }
   0xc   : > { %s795_s25 = scalar_select %p105_p7, %s700_s14, %s107_s21  }
   0xd   : > { %p159_p10 = pnand %p503_p6, %p158_p9 }
   0xe   : > { %p184_p11 = scmp.lt.s32.totalorder (!%p159_p10), %s704_s15, 1  ;;  %s715_s8 = smov (!%p159_p10), 124  }
   0xf   : > { %162 = sbr.rel (%p159_p10) target bundleno = 372 (0x174), region = 32  ;;  %s716_s9 = smov (!%p159_p10), 126  }
  0x10   : > { %s717_s10 = smov (!%p159_p10), 127   ;;  %s718_s11 = smov (!%p159_p10), 125  }
  0x11   : > { %s721_s28 = smov (!%p159_p10), [#allocation2]  }
  0x12   : > { %s640_s29 = sshll.u32 (!%p159_p10), %s721_s28, 4  ;;  %s641_s29 = int_to_ptr.vmem [resolvable:$false] %s640_s29 }
  0x13   : > { %s642_s30 = scalar_lea.vmem (!%p159_p10), %s641_s29, 256 }
  0x14   : > { %v198_v0 = vlaneseq  ;;  %v714_v1 = vmov 1983009808   ;;  %s185_s26 = scalar_select %p184_p11, %s704_s15, 1  ;;  %v628_v5 = vld [vmem:[%s889_s1] sm:$0xff]   ;;  %vm286_vm0 = vcmask 162816   ;;  %v719_v15 = vmov 0  }
  0x15   : > { %v196_v2 = vunpack.c.l.s4 %v714_v1  ;;  %v629_v6 = vld [vmem:[%s889_s1 + $0x20] sm:$0xff]   ;;  %540 = vmatprep.mubr.msk.bf16.mxu0 %vm286_vm0, %v628_v5  ;;  %624 = vset.pattern.permute.xlu0 %v719_v15  ;;  %v720_v16 = vmov 1   ;;  %vm219_vm1 = vcmask 1041408   ;;  %vm223_vm2 = vcmask 1043456   ;;  %v630_v25 = vld [vmem:[%s889_s1 + $0x8] sm:$0xff]   ;;  %v632_v27 = vld [vmem:[%s889_s1 + $0x10] sm:$0xff]  }
  0x16   : > { %v199_v3 = vshrl.u32 %v198_v0, 7  ;;  %s505_s27 = sshll.u32 %s185_s26, 1  ;;  %548 = vmatprep.mubr.msk.bf16.mxu1 %vm286_vm0, %v629_v6  ;;  %v396_v14 = vld [vmem:[%s890_s2] sm:$0xff]  ;;  %625 = vset.pattern.permute.xlu1 %v720_v16  ;;  %vm226_vm3 = vcmask 1045504   ;;  %v631_v26 = vld [vmem:[%s889_s1 + $0x28] sm:$0xff]   ;;  %v633_v28 = vld [vmem:[%s889_s1 + $0x30] sm:$0xff]  }
  0x17   : > { %v197_v4 = vunpack.c.0.s8 %v196_v2  ;;  %s190_s7 = scalar_lea.vmem %s888_s0, %s505_s27  ;;  %v634_v29 = vld [vmem:[%s889_s1 + $0x18] sm:$0xff]   ;;  %vm411_vm5 = vcmask 130048  }
  0x18   : > { %v192_v8 = vld [vmem:[%s190_s7] sm:$0x3]  ;;  %v635_v30 = vld [vmem:[%s889_s1 + $0x38] sm:$0xff]  }
  0x19   : > { %v200_v7 = vsub.s32 %v197_v4, %v199_v3  ;;  %v194_v10 = vcombine.low %v192_v8, %v192_v8 }
  0x1b   : > { %v208_v9 = vrot.slane %v192_v8, %v200_v7  ;;  %v201_v12 = vrot.slane %v194_v10, %v200_v7 }
  0x1d   : > { %217 = vrot.lane.b32.xlu0 %v208_v9, %s715_s8  ;;  %v211_v11 = vcombine.low %v208_v9, %v208_v9  ;;  %v214_v13 = vcombine.low %v201_v12, %v201_v12 }
  0x1f   : > { %212 = vrot.lane.b32.xlu1 %v211_v11, %s716_s9  ;;  %s181_s9 = sand.u32 1, %s696_s13  }
  0x21   : > { %209 = vrot.lane.b32.xlu0 %v201_v12, %s717_s10  ;;  %s504_s10 = sshll.u32 %s181_s9, 3 }
  0x22   : > { %s183_s18 = scalar_lea.vmem [#allocation2], %s504_s10 }
  0x23   : > { %215 = vrot.lane.b32.xlu1 %v214_v13, %s718_s11  ;;  %s523_s11 = sshll.u32 %s704_s15, 7  ;;  %s428_s19 = sshll.u32 %s183_s18, 4  ;;  %s844_s19 = int_to_ptr.vmem [resolvable:$true] %s428_s19 }
  0x24   : > { %s842_s26 = scalar_lea.hbm %s891_s3, %s523_s11  ;;  %s414_s15 = scalar_lea.sflag [#allocation3], %s181_s9 }
  0x25   : > { %399 = vperm.xlu0 %624, %v396_v14   ;;  %s636_s27 = scalar_lea.vmem %s844_s19, 128  ;;  %p643_p1 = scmp.lt.s32.totalorder %s844_s19, %s641_s29 }
  0x26   : > { %p637_p12 = scmp.ne.s32.totalorder %s844_s19, %s636_s27  ;;  %p644_p2 = scmp.lt.s32.totalorder %s642_s30, %s636_s27 }
  0x27   : > { %404 = vperm.xlu1 %625, %v396_v14  }
  0x28   : > { %p638_p13 = pnand %p637_p12, %p782_p4  ;;  %p645_p3 = por %p644_p2, %p643_p1 }
  0x29   : > { %626 = vset.pattern.permute.xlu0 %v720_v16 }
  0x2a   : > { %p639_p0 = pneg %p638_p13 }
  0x2c   : > { %p646_p5 = pnand %p645_p3, %p639_p0 }
  0x8f   : > { %v218_v17 = vpop.permute.xlu0 %217 }
  0x90   : > { %560 = vmatprep.subr.msk.bf16.mxu0 %vm219_vm1, %v218_v17  ;;  %561 = vmatprep.subr.msk.bf16.mxu1 %vm219_vm1, %v218_v17  ;;  %v312_v18 = vsel %vm219_vm1, %v218_v17, 0 }
  0x91   : > { %537 = vmatpush3.bf16.msra.mxu0 %v312_v18  ;;  %558 = vmatpush3.bf16.msra.mxu1 %v312_v18  ;;  %v213_v19 = vpop.permute.xlu1 %212 }
  0x93   : > { %v210_v20 = vpop.permute.xlu0 %209 }
  0x94   : > { %v222_v21 = vsel %vm219_vm1, %v192_v8, %v210_v20 }
  0x95   : > { %v225_v22 = vsel %vm223_vm2, %v222_v21, %v213_v19  ;;  %v216_v23 = vpop.permute.xlu1 %215 }
  0x96   : > { %v228_v24 = vsel %vm226_vm3, %v225_v22, %v216_v23 }
  0x97   : > { %538 = vmatprep.subr.bf16.mxu0 %v228_v24  ;;  %557 = vmatprep.subr.bf16.mxu1 %v228_v24 }
  0x98   : > { %539 = vmatpush3.bf16.msra.mxu0 %v228_v24  ;;  %559 = vmatpush3.bf16.msra.mxu1 %v228_v24 }
  0x9b   : > { %541 = vmatmul.mubr.msk.bf16.vlgmr.msra.gmra.mxu0 %vm286_vm0, %v630_v25  ;;  %549 = vmatmul.mubr.msk.bf16.vlgmr.msra.gmra.mxu1 %vm286_vm0, %v631_v26 }
  0x9c   : > { %544 = vmatprep.mubr.msk.bf16.mxu0 %vm286_vm0, %v632_v27  ;;  %552 = vmatprep.mubr.msk.bf16.mxu1 %vm286_vm0, %v633_v28 }
  0xa0   : > { %v400_v31 = vpop.permute.xlu0 %399 }
  0xa2   : > { %v405_v34 = vpop.permute.xlu1 %404 }
  0xa3   : > { %545 = vmatmul.mubr.msk.bf16.gmra.mxu0 %vm286_vm0, %v634_v29  ;;  %553 = vmatmul.mubr.msk.bf16.gmra.mxu1 %vm286_vm0, %v635_v30 }
 0x15b   : > { %v542_v32 = vpop.f32.mrf.mxu0  ;;  %v550_v33 = vpop.f32.mrf.mxu1 }
 0x15d   : > { %v348_v35 = vpop.f32.mrf.mxu0  ;;  %v373_v36 = vpop.f32.mrf.mxu1 }
 0x15e   : > { %v402_v37 = vmul.f32 %v400_v31, %v348_v35 }
 0x15f   : > { %v543_v38 = vpop.f32.mrf.mxu0  ;;  %v551_v39 = vpop.f32.mrf.mxu1 }
 0x160   : > { %v407_v40 = vadd.f32 %v405_v34, %v402_v37 }
 0x161   : > { %v351_v41 = vpop.f32.mrf.mxu0  ;;  %v375_v42 = vpop.f32.mrf.mxu1 }
 0x162   : > { %vm408_vm4 = vcmp.ge.f32.partialorder %v407_v40, 0.0  ;;  %v409_v43 = vmul.f32 0.1, %v407_v40 }
 0x163   : > { %v546_v44 = vpop.f32.mrf.mxu0  ;;  %v554_v45 = vpop.f32.mrf.mxu1 }
 0x164   : > { %v410_v46 = vsel %vm408_vm4, %v407_v40, %v409_v43 }
 0x165   : > { %v361_v47 = vpop.f32.mrf.mxu0  ;;  %v385_v48 = vpop.f32.mrf.mxu1  ;;  %412 = vst.msk [vmem:[%s183_s18] sm:$0xff] %vm411_vm5, %v410_v46 }
 0x166   : > { %649 = shalt.err (!%p646_p5)
}
 0x167   : > { %s650_s4 = scalar_lea.hbm %s842_s26, 128  ;;  %s654_s7 = scalar_lea.hbm %s891_s3, 256 }
 0x168   : > { %p651_p6 = scmp.ne.s32.totalorder %s842_s26, %s650_s4  ;;  %p655_p10 = scmp.lt.s32.totalorder %s842_s26, %s891_s3 }
 0x169   : > { %p656_p11 = scmp.lt.s32.totalorder %s654_s7, %s650_s4 }
 0x16a   : > { %p652_p7 = pnand %p651_p6, %p782_p4 }
 0x16b   : > { %p657_p12 = por %p656_p11, %p655_p10 }
 0x16c   : > { %p653_p9 = pneg %p652_p7 }
 0x16e   : > { %p658_p13 = pnand %p657_p12, %p653_p9 }
 0x170   : > { %661 = shalt.err (!%p658_p13)
}
 0x171   : > { %562 = dma.vmem_to_hbm [thread:$0]  (%p782_p4), %s844_s19, 128, %s842_s26, %s414_s15   ;;  %v547_v49 = vpop.f32.mrf.mxu0  ;;  %v555_v50 = vpop.f32.mrf.mxu1 }
 0x173   : > { %v363_v51 = vpop.f32.mrf.mxu0  ;;  %v387_v52 = vpop.f32.mrf.mxu1 }
 0x174 PF: > { %p568_p0 = scmp.ge.s32.totalorder %s712_s17, 2  ;;  %s440_s10 = sand.u32 1, %s692_s12  }
 0x175   : > { %s441_s11 = scalar_lea.sflag [#allocation3], %s440_s10 }
 0x176   : > { %p565_p1 = pnand %p568_p0, %p789_p8 }
 0x178   : > { %p566_p2 = pneg %p565_p1 }
 0x17a   : > { %687 = dma.done.wait (%p566_p2), %s441_s11, 128  }
 0x17b   : > { %689 = vsyncadd (%p566_p2), %s441_s11, 4294967168  ;;  %s16_s17 = sadd.s32 1, %s712_s17   ;;  %s894_s12 = smov %s696_s13 }
 0x17c   : > { %p13_p3 = scmp.ge.s32.totalorder %s16_s17, 4   ;;  %s895_s13 = smov %s700_s14 }
 0x17d   : > { %s896_s14 = smov %s795_s25  ;;  %s897_s15 = smov %s708_s16 }
 0x17e   : > { %s898_s16 = smov %s900_s20  ;;  %15 = sbr.rel (!%p13_p3) target bundleno = 4 (0x4), region = 67 }
 0x183   :  { %446 = vsyncpa [#allocation3], 1 }
 0x184   :  { %448 = vsyncpa [#allocation3 + $0x1], 1 }

// kernel: up_sampling_layer.2
= control target key start
LH: loop header
LB: loop body
LE: loop exit
PB: predicated region body
PF: predicated region fallthrough
CT: control target
= control target key end

     0   :  { %s838_s9 = smov 0   ;;  %s840_s10 = smov 0   ;;  %s1099_s0 = inlined_call_operand.vmem [shape: bf16[2,1,4,20], index: 0, kind: input, shape index: {}]   ;;  %s1100_s1 = inlined_call_operand.vmem [shape: bf16[128,20], index: 1, kind: input, shape index: {}]   ;;  %s1101_s2 = inlined_call_operand.vmem [shape: f32[2,128,8], index: 2, kind: output, shape index: {}]  }
   0x1   :  { %s842_s11 = smov 0  }
   0x2 LB: > { %s24_s12 = sadd.s32 1, %s811_s10  ;;  %p695_p0 = scmp.ge.s32.totalorder %s815_s11, 1  ;;  %s815_s11 = sphi %s842_s11, %s12_s11   ;;  %s811_s10 = sphi %s840_s10, %s1103_s10   ;;  %s807_s9 = sphi %s838_s9, %s1102_s9  }
   0x3   : > { %p26_p1 = scmp.ge.s32.totalorder %s24_s12, 2  ;;  %p128_p2 = scmp.lt.s32.totalorder %s815_s11, 3 }
   0x5   : > { %s1105_s12 = smov (%p26_p1, %s24_s12), 0  ;;  %p129_p3 = pnand %p695_p0, %p128_p2 }
   0x6   : > { %p152_p4 = scmp.lt.s32.totalorder (!%p129_p3), %s807_s9, 1  ;;  %s818_s21 = smov (!%p129_p3), 124  }
   0x7   : > { %132 = sbr.rel (%p129_p3) target bundleno = 549 (0x225), region = 28  ;;  %s819_s22 = smov (!%p129_p3), 126  }
   0x8   : > { %s820_s23 = smov (!%p129_p3), 127   ;;  %s821_s24 = smov (!%p129_p3), 125  }
   0xc   : > { %v171_v0 = vlaneseq  ;;  %v817_v1 = vmov 1983009808   ;;  %s1107_s9 = smov (!%p152_p4, %s807_s9), 1  ;;  %v785_v5 = vld [vmem:[%s1100_s1] sm:$0xff]   ;;  %vm259_vm0 = vcmask 162816   ;;  %vm192_vm1 = vcmask 1041408  }
   0xd   : > { %v169_v2 = vunpack.c.l.s4 %v817_v1  ;;  %s696_s13 = sshll.u32 %s1107_s9, 1  ;;  %v786_v6 = vld [vmem:[%s1100_s1 + $0x20] sm:$0xff]   ;;  %732 = vmatprep.mubr.msk.bf16.mxu0 %vm259_vm0, %v785_v5  ;;  %vm196_vm2 = vcmask 1043456   ;;  %vm199_vm3 = vcmask 1045504   ;;  %v787_v22 = vld [vmem:[%s1100_s1 + $0x8] sm:$0xff]   ;;  %v789_v24 = vld [vmem:[%s1100_s1 + $0x10] sm:$0xff]  }
   0xe   : > { %v172_v3 = vshrl.u32 %v171_v0, 7  ;;  %s158_s20 = scalar_lea.vmem %s1099_s0, %s696_s13  ;;  %740 = vmatprep.mubr.msk.bf16.mxu1 %vm259_vm0, %v786_v6  ;;  %v788_v23 = vld [vmem:[%s1100_s1 + $0x28] sm:$0xff]   ;;  %v791_v25 = vld [vmem:[%s1100_s1 + $0x30] sm:$0xff]   ;;  %v790_v26 = vld [vmem:[%s1100_s1 + $0x18] sm:$0xff]   ;;  %v894_v28 = vand.u32 127, %v171_v0  ;;  %vm429_vm5 = vcmask 130048  }
   0xf   : > { %v170_v4 = vunpack.c.0.s8 %v169_v2  ;;  %v165_v8 = vld [vmem:[%s158_s20] sm:$0x3]  ;;  %v792_v27 = vld [vmem:[%s1100_s1 + $0x38] sm:$0xff]   ;;  %s717_s13 = sshll.u32 %s1107_s9, 7  ;;  %vm412_vm6 = vcmask 64512   ;;  %v822_v0 = vmov 0.0  }
  0x10   : > { %v167_v10 = vcombine.low %v165_v8, %v165_v8  ;;  %vm389_vm4 = vcmp.lt.s32.totalorder %v894_v28, 16  ;;  %s929_s16 = scalar_lea.vmem %s1101_s2, %s717_s13  ;;  %vm542_vm7 = vcmask 7168   ;;  %vm559_vm8 = vcmask 15360  }
  0x11   : > { %v173_v7 = vsub.s32 %v170_v4, %v172_v3  ;;  %415 = vst.msk [vmem:[%s929_s16 + $0x10] sm:$0xff] %vm412_vm6, %v822_v0  ;;  %413 = vst.msk [vmem:[%s929_s16] sm:$0xff] %vm412_vm6, %v822_v0 }
  0x12   : > { %414 = vst.msk [vmem:[%s929_s16 + $0x8] sm:$0xff] %vm412_vm6, %v822_v0  ;;  %416 = vst.msk [vmem:[%s929_s16 + $0x18] sm:$0xff] %vm412_vm6, %v822_v0 }
  0x13   : > { %v181_v9 = vrot.slane %v165_v8, %v173_v7  ;;  %v174_v12 = vrot.slane %v167_v10, %v173_v7  ;;  %417 = vst.msk [vmem:[%s929_s16 + $0x20] sm:$0xff] %vm412_vm6, %v822_v0  ;;  %418 = vst.msk [vmem:[%s929_s16 + $0x28] sm:$0xff] %vm412_vm6, %v822_v0 }
  0x14   : > { %419 = vst.msk [vmem:[%s929_s16 + $0x30] sm:$0xff] %vm412_vm6, %v822_v0  ;;  %420 = vst.msk [vmem:[%s929_s16 + $0x38] sm:$0xff] %vm412_vm6, %v822_v0 }
  0x15   : > { %190 = vrot.lane.b32.xlu0 %v181_v9, %s818_s21  ;;  %v184_v11 = vcombine.low %v181_v9, %v181_v9  ;;  %v187_v13 = vcombine.low %v174_v12, %v174_v12  ;;  %421 = vst.msk [vmem:[%s929_s16 + $0x40] sm:$0xff] %vm412_vm6, %v822_v0  ;;  %422 = vst.msk [vmem:[%s929_s16 + $0x48] sm:$0xff] %vm412_vm6, %v822_v0 }
  0x16   : > { %423 = vst.msk [vmem:[%s929_s16 + $0x50] sm:$0xff] %vm412_vm6, %v822_v0  ;;  %424 = vst.msk [vmem:[%s929_s16 + $0x58] sm:$0xff] %vm412_vm6, %v822_v0 }
  0x17   : > { %185 = vrot.lane.b32.xlu1 %v184_v11, %s819_s22  ;;  %425 = vst.msk [vmem:[%s929_s16 + $0x60] sm:$0xff] %vm412_vm6, %v822_v0  ;;  %426 = vst.msk [vmem:[%s929_s16 + $0x68] sm:$0xff] %vm412_vm6, %v822_v0 }
  0x18   : > { %427 = vst.msk [vmem:[%s929_s16 + $0x70] sm:$0xff] %vm412_vm6, %v822_v0  ;;  %428 = vst.msk [vmem:[%s929_s16 + $0x78] sm:$0xff] %vm412_vm6, %v822_v0 }
  0x19   : > { %182 = vrot.lane.b32.xlu0 %v174_v12, %s820_s23 }
  0x1b   : > { %188 = vrot.lane.b32.xlu1 %v187_v13, %s821_s24 }
  0x87   : > { %v191_v14 = vpop.permute.xlu0 %190 }
  0x88   : > { %752 = vmatprep.subr.msk.bf16.mxu0 %vm192_vm1, %v191_v14  ;;  %753 = vmatprep.subr.msk.bf16.mxu1 %vm192_vm1, %v191_v14  ;;  %v285_v15 = vsel %vm192_vm1, %v191_v14, 0 }
  0x89   : > { %729 = vmatpush3.bf16.msra.mxu0 %v285_v15  ;;  %750 = vmatpush3.bf16.msra.mxu1 %v285_v15  ;;  %v186_v16 = vpop.permute.xlu1 %185 }
  0x8b   : > { %v183_v17 = vpop.permute.xlu0 %182 }
  0x8c   : > { %v195_v18 = vsel %vm192_vm1, %v165_v8, %v183_v17 }
  0x8d   : > { %v198_v19 = vsel %vm196_vm2, %v195_v18, %v186_v16  ;;  %v189_v20 = vpop.permute.xlu1 %188 }
  0x8e   : > { %v201_v21 = vsel %vm199_vm3, %v198_v19, %v189_v20 }
  0x8f   : > { %730 = vmatprep.subr.bf16.mxu0 %v201_v21  ;;  %749 = vmatprep.subr.bf16.mxu1 %v201_v21 }
  0x90   : > { %731 = vmatpush3.bf16.msra.mxu0 %v201_v21  ;;  %751 = vmatpush3.bf16.msra.mxu1 %v201_v21 }
  0x93   : > { %733 = vmatmul.mubr.msk.bf16.vlgmr.msra.gmra.mxu0 %vm259_vm0, %v787_v22  ;;  %741 = vmatmul.mubr.msk.bf16.vlgmr.msra.gmra.mxu1 %vm259_vm0, %v788_v23 }
  0x94   : > { %736 = vmatprep.mubr.msk.bf16.mxu0 %vm259_vm0, %v789_v24  ;;  %744 = vmatprep.mubr.msk.bf16.mxu1 %vm259_vm0, %v791_v25 }
  0x9b   : > { %737 = vmatmul.mubr.msk.bf16.gmra.mxu0 %vm259_vm0, %v790_v26  ;;  %745 = vmatmul.mubr.msk.bf16.gmra.mxu1 %vm259_vm0, %v792_v27 }
 0x153   : > { %v734_v29 = vpop.f32.mrf.mxu0  ;;  %v742_v30 = vpop.f32.mrf.mxu1 }
 0x154   : > { %v394_v31 = vsel %vm389_vm4, %v734_v29, 0.0  ;;  %v402_v32 = vsel %vm389_vm4, %v742_v30, 0.0 }
 0x155   : > { %v321_v33 = vpop.f32.mrf.mxu0  ;;  %v460_v34 = vsel %vm429_vm5, %v402_v32, 0.0  ;;  %v436_v35 = vsel %vm429_vm5, %v394_v31, 0.0  ;;  %v353_v36 = vpop.f32.mrf.mxu1  ;;  %v480_v42 = vmul.f32 %v394_v31, %v394_v31  ;;  %v488_v47 = vmul.f32 %v402_v32, %v402_v32 }
 0x156   : > { %v392_v37 = vsel %vm389_vm4, %v321_v33, 0.0  ;;  %461 = vadd.xlane.f32.xlu1 %v460_v34  ;;  %437 = vadd.xlane.f32.xlu0 %v436_v35  ;;  %v400_v38 = vsel %vm389_vm4, %v353_v36, 0.0 }
 0x157   : > { %v735_v39 = vpop.f32.mrf.mxu0  ;;  %v743_v40 = vpop.f32.mrf.mxu1  ;;  %v454_v41 = vsel %vm429_vm5, %v400_v38, 0.0  ;;  %v430_v43 = vsel %vm429_vm5, %v392_v37, 0.0  ;;  %v500_v48 = vsel %vm429_vm5, %v480_v42, 0.0  ;;  %v478_v54 = vmul.f32 %v392_v37, %v392_v37 }
 0x158   : > { %v395_v45 = vsel %vm389_vm4, %v735_v39, 0.0  ;;  %v403_v51 = vsel %vm389_vm4, %v743_v40, 0.0  ;;  %v524_v55 = vsel %vm429_vm5, %v488_v47, 0.0  ;;  %v486_v61 = vmul.f32 %v400_v38, %v400_v38 }
 0x159   : > { %v356_v44 = vpop.f32.mrf.mxu1  ;;  %v439_v49 = vsel %vm429_vm5, %v395_v45, 0.0  ;;  %v463_v56 = vsel %vm429_vm5, %v403_v51, 0.0  ;;  %v481_v60 = vmul.f32 %v395_v45, %v395_v45  ;;  %v494_v62 = vsel %vm429_vm5, %v478_v54, 0.0  ;;  %v324_v1 = vpop.f32.mrf.mxu0 }
 0x15a   : > { %455 = vadd.xlane.f32.xlu1 %v454_v41  ;;  %431 = vadd.xlane.f32.xlu0 %v430_v43  ;;  %v401_v58 = vsel %vm389_vm4, %v356_v44, 0.0  ;;  %v489_v2 = vmul.f32 %v403_v51, %v403_v51  ;;  %v518_v3 = vsel %vm429_vm5, %v486_v61, 0.0  ;;  %v393_v5 = vsel %vm389_vm4, %v324_v1, 0.0 }
 0x15b   : > { %v746_v46 = vpop.f32.mrf.mxu1  ;;  %v457_v63 = vsel %vm429_vm5, %v401_v58, 0.0  ;;  %v503_v4 = vsel %vm429_vm5, %v481_v60, 0.0  ;;  %v738_v6 = vpop.f32.mrf.mxu0  ;;  %v479_v8 = vmul.f32 %v393_v5, %v393_v5  ;;  %v433_v10 = vsel %vm429_vm5, %v393_v5, 0.0 }
 0x15c   : > { %v398_v7 = vsel %vm389_vm4, %v738_v6, 0.0  ;;  %v527_v9 = vsel %vm429_vm5, %v489_v2, 0.0  ;;  %v406_v12 = vsel %vm389_vm4, %v746_v46, 0.0  ;;  %v487_v13 = vmul.f32 %v401_v58, %v401_v58  ;;  %v579_v6 = vld [vmem:[%s929_s16 + $0x18] sm:$0xff] }
 0x15d   : > { %v913_v50 = vpop.f32.mrf.mxu1  ;;  %v448_v11 = vsel %vm429_vm5, %v398_v7, 0.0  ;;  %v337_v14 = vpop.f32.mrf.mxu0  ;;  %v497_v15 = vsel %vm429_vm5, %v479_v8, 0.0  ;;  %v472_v16 = vsel %vm429_vm5, %v406_v12, 0.0  ;;  %v484_v25 = vmul.f32 %v398_v7, %v398_v7 }
 0x15e   : > { %501 = vadd.xlane.f32.xlu1 %v500_v48  ;;  %440 = vadd.xlane.f32.xlu0 %v439_v49  ;;  %v521_v18 = vsel %vm429_vm5, %v487_v13, 0.0  ;;  %v396_v19 = vsel %vm389_vm4, %v337_v14, 0.0  ;;  %v404_v23 = vsel %vm389_vm4, %v913_v50, 0.0  ;;  %v492_v39 = vmul.f32 %v406_v12, %v406_v12  ;;  %v578_v50 = vld [vmem:[%s929_s16 + $0x10] sm:$0xff]  ;;  %v587_v14 = vld [vmem:[%s929_s16 + $0x58] sm:$0xff] }
 0x15f   : > { %v747_v52 = vpop.f32.mrf.mxu1  ;;  %v739_v17 = vpop.f32.mrf.mxu0  ;;  %v442_v21 = vsel %vm429_vm5, %v396_v19, 0.0  ;;  %v466_v26 = vsel %vm429_vm5, %v404_v23, 0.0  ;;  %v482_v31 = vmul.f32 %v396_v19, %v396_v19  ;;  %v512_v32 = vsel %vm429_vm5, %v484_v25, 0.0 }
 0x160   : > { %v920_v53 = vsel %vm389_vm4, %v747_v52, 0.0  ;;  %v399_v20 = vsel %vm389_vm4, %v739_v17, 0.0  ;;  %v490_v36 = vmul.f32 %v404_v23, %v404_v23  ;;  %v536_v43 = vsel %vm429_vm5, %v492_v39, 0.0 }
 0x161   : > { %v493_v57 = vmul.f32 %v920_v53, %v920_v53  ;;  %v451_v22 = vsel %vm429_vm5, %v399_v20, 0.0  ;;  %v340_v24 = vpop.f32.mrf.mxu0  ;;  %v475_v27 = vsel %vm429_vm5, %v920_v53, 0.0  ;;  %v372_v30 = vpop.f32.mrf.mxu1  ;;  %v485_v35 = vmul.f32 %v399_v20, %v399_v20  ;;  %v577_v20 = vld [vmem:[%s929_s16 + $0x8] sm:$0xff] }
 0x162   : > { %525 = vadd.xlane.f32.xlu1 %v524_v55  ;;  %464 = vadd.xlane.f32.xlu0 %v463_v56  ;;  %v397_v29 = vsel %vm389_vm4, %v340_v24, 0.0  ;;  %v405_v34 = vsel %vm389_vm4, %v372_v30, 0.0  ;;  %v506_v37 = vsel %vm429_vm5, %v482_v31, 0.0  ;;  %v530_v41 = vsel %vm429_vm5, %v490_v36, 0.0  ;;  %v586_v56 = vld [vmem:[%s929_s16 + $0x50] sm:$0xff] }
 0x163   : > { %v934_v59 = vsel %vm429_vm5, %v493_v57, 0.0  ;;  %v445_v33 = vsel %vm429_vm5, %v397_v29, 0.0  ;;  %v469_v38 = vsel %vm429_vm5, %v405_v34, 0.0  ;;  %v483_v40 = vmul.f32 %v397_v29, %v397_v29 }
 0x164   : > { %v515_v42 = vsel %vm429_vm5, %v485_v35, 0.0  ;;  %v491_v28 = vmul.f32 %v405_v34, %v405_v34 }
 0x165   : > { %v509_v44 = vsel %vm429_vm5, %v483_v40, 0.0 }
 0x166   : > { %495 = vadd.xlane.f32.xlu1 %v494_v62  ;;  %458 = vadd.xlane.f32.xlu0 %v457_v63  ;;  %v533_v45 = vsel %vm429_vm5, %v491_v28, 0.0  ;;  %v576_v62 = vld [vmem:[%s929_s16] sm:$0xff] }
 0x167   : > { %v580_v28 = vld [vmem:[%s929_s16 + $0x20] sm:$0xff] }
 0x16a   : > { %519 = vadd.xlane.f32.xlu1 %v518_v3  ;;  %504 = vadd.xlane.f32.xlu0 %v503_v4  ;;  %v584_v4 = vld [vmem:[%s929_s16 + $0x40] sm:$0xff] }
 0x16e   : > { %528 = vadd.xlane.f32.xlu0 %v527_v9  ;;  %434 = vadd.xlane.f32.xlu1 %v433_v10 }
 0x172   : > { %498 = vadd.xlane.f32.xlu0 %v497_v15  ;;  %449 = vadd.xlane.f32.xlu1 %v448_v11 }
 0x176   : > { %522 = vadd.xlane.f32.xlu0 %v521_v18  ;;  %473 = vadd.xlane.f32.xlu1 %v472_v16 }
 0x17a   : > { %443 = vadd.xlane.f32.xlu1 %v442_v21  ;;  %452 = vadd.xlane.f32.xlu0 %v451_v22 }
 0x17e   : > { %467 = vadd.xlane.f32.xlu1 %v466_v26  ;;  %476 = vadd.xlane.f32.xlu0 %v475_v27  ;;  %v585_v26 = vld [vmem:[%s929_s16 + $0x48] sm:$0xff] }
 0x182   : > { %513 = vadd.xlane.f32.xlu1 %v512_v32  ;;  %446 = vadd.xlane.f32.xlu0 %v445_v33 }
 0x186   : > { %507 = vadd.xlane.f32.xlu1 %v506_v37  ;;  %470 = vadd.xlane.f32.xlu0 %v469_v38  ;;  %v582_v37 = vld [vmem:[%s929_s16 + $0x30] sm:$0xff] }
 0x18a   : > { %531 = vadd.xlane.f32.xlu1 %v530_v41  ;;  %516 = vadd.xlane.f32.xlu0 %v515_v42 }
 0x18e   : > { %537 = vadd.xlane.f32.xlu1 %v536_v43  ;;  %510 = vadd.xlane.f32.xlu0 %v509_v44 }
 0x192   : > { %534 = vadd.xlane.f32.xlu0 %v533_v45 }
 0x196   : > { %540 = vadd.xlane.f32.xlu0 %v934_v59 }
 0x1df   : > { %v462_v46 = vpop.xlane.xlu1 %461  ;;  %v438_v47 = vpop.xlane.xlu0 %437 }
 0x1e3   : > { %v456_v48 = vpop.xlane.xlu1 %455  ;;  %v432_v49 = vpop.xlane.xlu0 %431 }
 0x1e7   : > { %v502_v51 = vpop.xlane.xlu1 %501  ;;  %v441_v52 = vpop.xlane.xlu0 %440 }
 0x1e8   : > { %v545_v53 = vsel %vm542_vm7, %v438_v47, %v502_v51 }
 0x1e9   : > { %v562_v54 = vsel %vm559_vm8, %v545_v53, 0.0 }
 0x1ea   : > { %v594_v55 = vadd.f32 %v578_v50, %v562_v54  ;;  %v583_v50 = vld [vmem:[%s929_s16 + $0x38] sm:$0xff] }
 0x1eb   : > { %v526_v57 = vpop.xlane.xlu1 %525  ;;  %v465_v58 = vpop.xlane.xlu0 %464 }
 0x1ec   : > { %611 = vst.msk [vmem:[%s929_s16 + $0x10] sm:$0xff] %vm412_vm6, %v594_v55  ;;  %v553_v59 = vsel %vm542_vm7, %v462_v46, %v526_v57 }
 0x1ed   : > { %v570_v60 = vsel %vm559_vm8, %v553_v59, 0.0 }
 0x1ee   : > { %v602_v61 = vadd.f32 %v586_v56, %v570_v60  ;;  %v581_v60 = vld [vmem:[%s929_s16 + $0x28] sm:$0xff] }
 0x1ef   : > { %v496_v63 = vpop.xlane.xlu1 %495  ;;  %v459_v0 = vpop.xlane.xlu0 %458 }
 0x1f0   : > { %619 = vst.msk [vmem:[%s929_s16 + $0x50] sm:$0xff] %vm412_vm6, %v602_v61  ;;  %v543_v1 = vsel %vm542_vm7, %v432_v49, %v496_v63 }
 0x1f1   : > { %v560_v2 = vsel %vm559_vm8, %v543_v1, 0.0 }
 0x1f2   : > { %v592_v3 = vadd.f32 %v576_v62, %v560_v2 }
 0x1f3   : > { %v520_v5 = vpop.xlane.xlu1 %519  ;;  %v505_v7 = vpop.xlane.xlu0 %504 }
 0x1f4   : > { %609 = vst.msk [vmem:[%s929_s16] sm:$0xff] %vm412_vm6, %v592_v3  ;;  %v551_v8 = vsel %vm542_vm7, %v456_v48, %v520_v5  ;;  %v546_v9 = vsel %vm542_vm7, %v441_v52, %v505_v7  ;;  %v588_v48 = vld [vmem:[%s929_s16 + $0x60] sm:$0xff] }
 0x1f5   : > { %v568_v10 = vsel %vm559_vm8, %v551_v8, 0.0  ;;  %v563_v11 = vsel %vm559_vm8, %v546_v9, 0.0  ;;  %v591_v9 = vld [vmem:[%s929_s16 + $0x78] sm:$0xff] }
 0x1f6   : > { %v600_v12 = vadd.f32 %v584_v4, %v568_v10  ;;  %v595_v13 = vadd.f32 %v579_v6, %v563_v11  ;;  %v589_v4 = vld [vmem:[%s929_s16 + $0x68] sm:$0xff] }
 0x1f7   : > { %v529_v15 = vpop.xlane.xlu0 %528  ;;  %v435_v16 = vpop.xlane.xlu1 %434 }
 0x1f8   : > { %617 = vst.msk [vmem:[%s929_s16 + $0x40] sm:$0xff] %vm412_vm6, %v600_v12  ;;  %612 = vst.msk [vmem:[%s929_s16 + $0x18] sm:$0xff] %vm412_vm6, %v595_v13  ;;  %v554_v17 = vsel %vm542_vm7, %v465_v58, %v529_v15  ;;  %v590_v58 = vld [vmem:[%s929_s16 + $0x70] sm:$0xff] }
 0x1f9   : > { %v571_v18 = vsel %vm559_vm8, %v554_v17, 0.0 }
 0x1fa   : > { %v603_v19 = vadd.f32 %v587_v14, %v571_v18 }
 0x1fb   : > { %v499_v21 = vpop.xlane.xlu0 %498  ;;  %v450_v22 = vpop.xlane.xlu1 %449 }
 0x1fc   : > { %620 = vst.msk [vmem:[%s929_s16 + $0x58] sm:$0xff] %vm412_vm6, %v603_v19  ;;  %v544_v23 = vsel %vm542_vm7, %v435_v16, %v499_v21 }
 0x1fd   : > { %v561_v24 = vsel %vm559_vm8, %v544_v23, 0.0 }
 0x1fe   : > { %v593_v25 = vadd.f32 %v577_v20, %v561_v24 }
 0x1ff   : > { %v523_v27 = vpop.xlane.xlu0 %522  ;;  %v474_v29 = vpop.xlane.xlu1 %473 }
 0x200   : > { %610 = vst.msk [vmem:[%s929_s16 + $0x8] sm:$0xff] %vm412_vm6, %v593_v25  ;;  %v552_v30 = vsel %vm542_vm7, %v459_v0, %v523_v27 }
 0x201   : > { %v569_v31 = vsel %vm559_vm8, %v552_v30, 0.0 }
 0x202   : > { %v601_v32 = vadd.f32 %v585_v26, %v569_v31 }
 0x203   : > { %v444_v33 = vpop.xlane.xlu1 %443  ;;  %v453_v34 = vpop.xlane.xlu0 %452 }
 0x204   : > { %618 = vst.msk [vmem:[%s929_s16 + $0x48] sm:$0xff] %vm412_vm6, %v601_v32 }
 0x207   : > { %v468_v35 = vpop.xlane.xlu1 %467  ;;  %v477_v36 = vpop.xlane.xlu0 %476 }
 0x20b   : > { %v514_v38 = vpop.xlane.xlu1 %513  ;;  %v447_v39 = vpop.xlane.xlu0 %446 }
 0x20c   : > { %v549_v40 = vsel %vm542_vm7, %v450_v22, %v514_v38 }
 0x20d   : > { %v566_v41 = vsel %vm559_vm8, %v549_v40, 0.0 }
 0x20e   : > { %v598_v42 = vadd.f32 %v582_v37, %v566_v41 }
 0x20f   : > { %v508_v43 = vpop.xlane.xlu1 %507  ;;  %v471_v44 = vpop.xlane.xlu0 %470 }
 0x210   : > { %615 = vst.msk [vmem:[%s929_s16 + $0x30] sm:$0xff] %vm412_vm6, %v598_v42  ;;  %v547_v45 = vsel %vm542_vm7, %v444_v33, %v508_v43 }
 0x211   : > { %v564_v46 = vsel %vm559_vm8, %v547_v45, 0.0 }
 0x212   : > { %v596_v47 = vadd.f32 %v580_v28, %v564_v46 }
 0x213   : > { %v532_v49 = vpop.xlane.xlu1 %531  ;;  %v517_v51 = vpop.xlane.xlu0 %516 }
 0x214   : > { %613 = vst.msk [vmem:[%s929_s16 + $0x20] sm:$0xff] %vm412_vm6, %v596_v47  ;;  %v555_v52 = vsel %vm542_vm7, %v468_v35, %v532_v49  ;;  %v550_v53 = vsel %vm542_vm7, %v453_v34, %v517_v51 }
 0x215   : > { %v572_v54 = vsel %vm559_vm8, %v555_v52, 0.0  ;;  %v567_v55 = vsel %vm559_vm8, %v550_v53, 0.0 }
 0x216   : > { %v604_v56 = vadd.f32 %v588_v48, %v572_v54  ;;  %v599_v57 = vadd.f32 %v583_v50, %v567_v55 }
 0x217   : > { %v538_v59 = vpop.xlane.xlu1 %537  ;;  %v511_v61 = vpop.xlane.xlu0 %510 }
 0x218   : > { %621 = vst.msk [vmem:[%s929_s16 + $0x60] sm:$0xff] %vm412_vm6, %v604_v56  ;;  %616 = vst.msk [vmem:[%s929_s16 + $0x38] sm:$0xff] %vm412_vm6, %v599_v57  ;;  %v557_v62 = vsel %vm542_vm7, %v474_v29, %v538_v59  ;;  %v548_v63 = vsel %vm542_vm7, %v447_v39, %v511_v61 }
 0x219   : > { %v574_v0 = vsel %vm559_vm8, %v557_v62, 0.0  ;;  %v565_v1 = vsel %vm559_vm8, %v548_v63, 0.0 }
 0x21a   : > { %v606_v2 = vadd.f32 %v590_v58, %v574_v0  ;;  %v597_v3 = vadd.f32 %v581_v60, %v565_v1 }
 0x21b   : > { %v535_v5 = vpop.xlane.xlu0 %534 }
 0x21c   : > { %623 = vst.msk [vmem:[%s929_s16 + $0x70] sm:$0xff] %vm412_vm6, %v606_v2  ;;  %614 = vst.msk [vmem:[%s929_s16 + $0x28] sm:$0xff] %vm412_vm6, %v597_v3  ;;  %v556_v6 = vsel %vm542_vm7, %v471_v44, %v535_v5 }
 0x21d   : > { %v573_v7 = vsel %vm559_vm8, %v556_v6, 0.0 }
 0x21e   : > { %v605_v8 = vadd.f32 %v589_v4, %v573_v7 }
 0x21f   : > { %v541_v10 = vpop.xlane.xlu0 %540 }
 0x220   : > { %622 = vst.msk [vmem:[%s929_s16 + $0x68] sm:$0xff] %vm412_vm6, %v605_v8  ;;  %v558_v11 = vsel %vm542_vm7, %v477_v36, %v541_v10 }
 0x221   : > { %v575_v12 = vsel %vm559_vm8, %v558_v11, 0.0 }
 0x222   : > { %v607_v13 = vadd.f32 %v591_v9, %v575_v12 }
 0x224   : > { %624 = vst.msk [vmem:[%s929_s16 + $0x78] sm:$0xff] %vm412_vm6, %v607_v13 }
 0x225 PF: > { %s12_s11 = sadd.s32 1, %s815_s11   ;;  %s1102_s9 = smov %s811_s10 }
 0x226   : > { %p9_p5 = scmp.ge.s32.totalorder %s12_s11, 4   ;;  %s1103_s10 = smov %s1105_s12 }
 0x228   :  { %11 = sbr.rel (!%p9_p5) target bundleno = 2 (0x2), region = 62 }

</bundles_post_ra>
